<compile_context>
chip_gen: v7x
topology: tpu7x:2x2x1
jax: 0.10.0
libtpu: 0.0.40
codegen_flags: <defaults>
</compile_context>

<pallas_src>
import jax
import jax.numpy as jnp
from jax.experimental import pallas as pl
from jax.experimental.pallas import tpu as pltpu

_XLA_FALLBACK_MAX_ELEMS = 64 * 1024


def _linreg_kernel(wb_ref, x_ref, o_ref):
    # wb_ref: (2,) f32 scalars in SMEM (scalar-prefetched): [weight, bias]
    # x_ref, o_ref: (tile_rows, lane) tile in VMEM
    x = x_ref[...]
    if x.dtype == jnp.bfloat16:
        # bf16 VALU path (v6e/v7x): halves vreg pressure and vld/vst traffic.
        w = wb_ref[0].astype(jnp.bfloat16)
        b = wb_ref[1].astype(jnp.bfloat16)
    else:
        x = x.astype(jnp.float32)
        w = wb_ref[0]
        b = wb_ref[1]
    o_ref[...] = (x * w + b).astype(o_ref.dtype)


def _chip_budgets():
    """Return (tile_cap_bytes, vmem_limit_bytes) tuned per TPU generation."""
    kind = ""
    try:
        kind = jax.devices()[0].device_kind.lower()
    except Exception:
        pass
    if "v5" in kind or "v6" in kind:
        # 128 MiB physical VMEM: big tiles amortize the ~0.35us per-step cost.
        return 16 * 1024 * 1024, 96 * 1024 * 1024
    # v7x (64 MiB VMEM) and unknown chips: keep the double-buffered in+out
    # working set (~4x tile bytes) comfortably under the scoped limit.
    return 8 * 1024 * 1024, 48 * 1024 * 1024


def _choose_lane(total: int) -> int:
    # Prefer a lane width (multiple of 128) that divides the flat size exactly,
    # so no padding / extra HBM pass is needed; otherwise lane=128 keeps the
    # padded tail under 128 elements.
    for lane in (1024, 512, 256, 128):
        if total % lane == 0:
            return lane
    return 128


def _choose_tiling(total: int, itemsize: int, tile_cap_bytes: int):
    lane = _choose_lane(total)
    rows = pl.cdiv(total, lane)
    max_tile_rows = max(8, (tile_cap_bytes // (lane * itemsize)) // 8 * 8)
    tile_rows = min(max_tile_rows, pl.cdiv(rows, 8) * 8)
    # Give the "parallel" grid axis at least 2 steps when there is enough data
    # (lets v7x's two TensorCores split the stream).
    if rows > 8 and tile_rows >= rows:
        tile_rows = max(8, pl.cdiv(pl.cdiv(rows, 2), 8) * 8)
    grid = pl.cdiv(rows, tile_rows)
    return lane, rows, tile_rows, grid


def linear_regression_forward(x: jax.Array, weights: jax.Array, bias: jax.Array) -> jax.Array:
    """y = x * weights + bias with weights/bias of shape (1,), like nn.Parameter(randn(1))."""
    orig_shape = x.shape
    orig_dtype = x.dtype
    total = x.size

    # Tiny inputs: a standalone Pallas call costs more than the work itself.
    if total < _XLA_FALLBACK_MAX_ELEMS:
        return x * weights + bias

    tile_cap_bytes, vmem_limit_bytes = _chip_budgets()
    lane, rows, tile_rows, grid = _choose_tiling(total, x.dtype.itemsize, tile_cap_bytes)

    padded_total = rows * lane
    x_flat = x.reshape(-1)
    if padded_total != total:
        # Only the flat tail (< lane elements) is padded; aligned sizes skip this pass.
        x_flat = jnp.pad(x_flat, (0, padded_total - total))
    x2 = x_flat.reshape(rows, lane)

    # Pack weight and bias into one (2,) f32 scalar-prefetch array (SMEM, loaded once).
    wb = jnp.concatenate([weights.reshape(1), bias.reshape(1)]).astype(jnp.float32)

    y2 = pl.pallas_call(
        _linreg_kernel,
        out_shape=jax.ShapeDtypeStruct((rows, lane), orig_dtype),
        grid_spec=pltpu.PrefetchScalarGridSpec(
            num_scalar_prefetch=1,
            grid=(grid,),
            in_specs=[pl.BlockSpec((tile_rows, lane), lambda i, wb_ref: (i, 0))],
            out_specs=pl.BlockSpec((tile_rows, lane), lambda i, wb_ref: (i, 0)),
        ),
        compiler_params=pltpu.CompilerParams(
            # Independent row tiles -> shard across v7x's 2 TensorCores.
            dimension_semantics=("parallel",),
            vmem_limit_bytes=vmem_limit_bytes,
        ),
    )(wb, x2)

    if padded_total != total:
        return y2.reshape(-1)[:total].reshape(orig_shape)
    return y2.reshape(orig_shape)


if __name__ == "__main__":
    key = jax.random.PRNGKey(0)
    kw, kb, k1, k2, k3, k4 = jax.random.split(key, 6)

    # Deterministic "randn(1)" parameters, as in the module's __init__.
    weights = jax.random.normal(kw, (1,), dtype=jnp.float32)
    bias = jax.random.normal(kb, (1,), dtype=jnp.float32)

    # Small regression-workflow inputs (XLA fallback) plus two larger inputs
    # that exercise the Pallas path: exactly aligned and padded/ragged.
    xs = [
        jax.random.normal(k1, (16, 1), dtype=jnp.float32),      # XLA fallback
        jax.random.normal(k2, (1000, 1), dtype=jnp.float32),    # XLA fallback
        jax.random.normal(k3, (512, 256), dtype=jnp.float32),   # Pallas, aligned (no pad/slice)
        jax.random.normal(k4, (70000,), dtype=jnp.float32),     # Pallas, padded tail + ragged tile
    ]

    ok = True
    for x in xs:
        y = jax.block_until_ready(linear_regression_forward(x, weights, bias))
        y_ref = x * weights + bias  # plain-JAX reference (== PyTorch broadcast)
        ok = ok and (y.shape == x.shape) and (y.dtype == x.dtype)
        ok = ok and bool(jnp.allclose(y, y_ref, atol=1e-6, rtol=1e-6))

    assert ok, "mismatch vs reference"
    print("KERNEL_OK")
</pallas_src>

<mosaic_0001>
module attributes {stable_mosaic.version = 11 : i64} {
  func.func @_linreg_kernel(%arg0: i32, %arg1: memref<2xf32, #tpu.memory_space<smem>>, %arg2: memref<64x1024xf32, #tpu.memory_space<vmem>>, %arg3: memref<64x1024xf32, #tpu.memory_space<vmem>>) attributes {dimension_semantics = [#tpu.dimension_semantics<parallel>], iteration_bounds = array<i64: 2>, scalar_prefetch = 1 : i64, scratch_operands = 0 : i64, tpu.core_type = #tpu.core_type<tc>, window_params = [{transform_indices = @transform_0, window_bounds = array<i64: 64, 1024>}, {transform_indices = @transform_1, window_bounds = array<i64: 64, 1024>}]} {
    %c0 = arith.constant 0 : index
    %c0_0 = arith.constant 0 : index
    %0 = vector.load %arg2[%c0, %c0_0] : memref<64x1024xf32, #tpu.memory_space<vmem>>, vector<64x1024xf32>
    %c0_1 = arith.constant 0 : index
    %1 = memref.load %arg1[%c0_1] : memref<2xf32, #tpu.memory_space<smem>>
    %c1 = arith.constant 1 : index
    %2 = memref.load %arg1[%c1] : memref<2xf32, #tpu.memory_space<smem>>
    %3 = vector.broadcast %1 : f32 to vector<64x1024xf32>
    %4 = arith.mulf %0, %3 : vector<64x1024xf32>
    %5 = vector.broadcast %2 : f32 to vector<64x1024xf32>
    %6 = arith.addf %4, %5 : vector<64x1024xf32>
    %c0_2 = arith.constant 0 : index
    %c0_3 = arith.constant 0 : index
    %7 = vector.load %arg3[%c0_2, %c0_3] : memref<64x1024xf32, #tpu.memory_space<vmem>>, vector<64x1024xf32>
    tpu.vector_store %arg3[%c0_2, %c0_3], %6 {strides = array<i32>} : memref<64x1024xf32, #tpu.memory_space<vmem>>, vector<64x1024xf32>,
    return
  }
  func.func @transform_0(%arg0: i32, %arg1: memref<2xf32, #tpu.memory_space<smem>>) -> (i32, i32) {
    %c0_i32 = arith.constant 0 : i32
    %c0_i32_0 = arith.constant 0 : i32
    return %arg0, %c0_i32 : i32, i32
  }
  func.func @transform_1(%arg0: i32, %arg1: memref<2xf32, #tpu.memory_space<smem>>) -> (i32, i32) {
    %c0_i32 = arith.constant 0 : i32
    %c0_i32_0 = arith.constant 0 : i32
    return %arg0, %c0_i32 : i32, i32
  }
}

</mosaic_0001>

<bundles_post_ra>
// kernel: tpu_custom_call.1
= control target key start
LH: loop header
LB: loop body
LE: loop exit
PB: predicated region body
PF: predicated region fallthrough
CT: control target
= control target key end

     0   :  { %s1138_s0 = inlined_call_operand.hbm [shape: f32[2], index: 0, kind: input, shape index: {}]   ;;  %s1139_s1 = inlined_call_operand.hbm [shape: f32[128,1024], index: 1, kind: input, shape index: {}]   ;;  %s1140_s2 = inlined_call_operand.hbm [shape: f32[128,1024], index: 2, kind: output, shape index: {}]  }
   0x1   :  { %s563_s11 = scalar_lea.hbm %s1138_s0, 16 }
   0x2   :  { %p564_p0 = scmp.ne.s32.totalorder %s1138_s0, %s563_s11  ;;  %p567_p1 = scmp.lt.u32.totalorder %s563_s11, %s1138_s0 }
   0x4   :  { %p569_p2 = pnand %p567_p1, %p564_p0 }
   0x6   :  { %572 = shalt.err (!%p569_p2)  }
   0x7   :  { %s673_s16 = smov [#allocation3]  }
   0x8   :  { %8 = dma.hbm_to_smem %s1138_s0, 16, %s673_s16, [#allocation2] }
   0x9   :  { %647 = dma.done.wait [#allocation2], 16 }
   0xa   :  { %648 = vsyncadd [#allocation2], 4294967280 }
   0xb   :  { %10 = sfence }
   0xc   :  { %11 = vsyncpa [#allocation5], 0 }
   0xd   :  { %13 = vsyncpa [#allocation5 + $0x1], 0 }
   0xe   :  { %14 = vsyncpa [#allocation6], 0 }
   0xf   :  { %16 = vsyncpa [#allocation6 + $0x1], 0  ;;  %s707_s19 = smov 0   ;;  %s709_s20 = smov 0  }
  0x10   :  { %s711_s21 = smov 0   ;;  %s713_s22 = smov 0  }
  0x11 LB: > { %s728_s0 = sadd.s32 4294967295, %s671_s22   ;;  %s491_s23 = sadd.s32 4294967294, %s671_s22   ;;  %s671_s22 = sphi %s713_s22, %s1153_s22   ;;  %s667_s21 = sphi %s711_s21, %s1152_s21   ;;  %s663_s20 = sphi %s709_s20, %s1151_s20   ;;  %s659_s19 = sphi %s707_s19, %s1150_s19  }
  0x12   : > { %s732_s24 = sadd.s32 1, %s671_s22   ;;  %s29_s25 = sadd.s32 1, %s667_s21 }
  0x13   : > { %s26_s26 = ssub.s32 %s671_s22, %s732_s24  ;;  %p36_p3 = scmp.ne.s32.totalorder %s667_s21, %s663_s20 }
  0x14   : > { %p27_p4 = scmp.eq.s32.totalorder %s26_s26, 0  ;;  %p37_p5 = scmp.eq.s32.totalorder %s671_s22, 0 }
  0x15   : > { %p42_p6 = scmp.ne.s32.totalorder %s663_s20, %s659_s19  ;;  %p43_p7 = scmp.eq.s32.totalorder %s728_s0, 0 }
  0x16   : > { %s744_s27 = scalar_select %p27_p4, %s667_s21, %s29_s25  }
  0x17   : > { %p746_p8 = por %p37_p5, %p36_p3  ;;  %p750_p9 = por %p43_p7, %p42_p6 }
  0x18   : > { %p66_p10 = scmp.eq.s32.totalorder %s728_s0, 1  ;;  %p72_p11 = scmp.eq.s32.totalorder %s491_s23, 1 }
  0x19   : > { %p524_p13 = scmp.lt.s32.totalorder %s671_s22, 2  ;;  %s92_s4 = sand.u32 1, %s667_s21  }
  0x1a   : > { %p757_p0 = por %p66_p10, %p36_p3  ;;  %p761_p1 = por %p72_p11, %p42_p6 }
  0x1b   : > { %s509_s5 = sshll.u32 %s671_s22, 13  ;;  %s494_s6 = sshll.u32 %s92_s4, 9 }
  0x1c   : > { %s1144_s30 = scalar_select %p757_p0, 1, 0 }
  0x1d   : > { %s1145_s3 = scalar_select %p761_p1, 1, 0 }
  0x1e   : > { %s770_s9 = scalar_lea.hbm %s1139_s1, %s509_s5  ;;  %s96_s10 = scalar_lea.vmem [#allocation4], %s494_s6 }
  0x1f   : > { %s104_s11 = sshll.u32 %s96_s10, 4  ;;  %p774_p2 = pnand %p524_p13, %p746_p8  ;;  %s778_s11 = int_to_ptr.vmem [resolvable:$true] %s104_s11 }
  0x20   : > { %s780_s13 = scalar_lea.sflag [#allocation5], %s92_s4  ;;  %s573_s14 = scalar_lea.hbm %s770_s9, 8192 }
  0x21   : > { %p574_p3 = scmp.ne.s32.totalorder %s770_s9, %s573_s14  ;;  %p575_p4 = pneg %p774_p2 }
  0x22   : > { %s578_s17 = scalar_lea.hbm %s1139_s1, 16384  ;;  %p579_p7 = scmp.lt.u32.totalorder %s770_s9, %s1139_s1 }
  0x23   : > { %p576_p5 = pnand %p575_p4, %p574_p3  ;;  %p580_p8 = scmp.lt.u32.totalorder %s578_s17, %s573_s14 }
  0x24   : > { %p582_p11 = scmp.lt.u32.totalorder %s573_s14, %s770_s9 }
  0x25   : > { %p577_p6 = pneg %p576_p5  ;;  %p581_p10 = por %p580_p8, %p579_p7 }
  0x27   : > { %p583_p13 = por %p582_p11, %p581_p10 }
  0x29   : > { %p584_p12 = pnand %p583_p13, %p577_p6 }
  0x2b   : > { %587 = shalt.err (!%p584_p12)
}
  0x2c   : > { %s588_s25 = scalar_lea.vmem %s778_s11, 8192  ;;  %s674_s26 = smov [#allocation4]  }
  0x2d   : > { %p589_p3 = scmp.ne.s32.totalorder %s778_s11, %s588_s25  ;;  %s593_s28 = sshll.u32 %s674_s26, 4  ;;  %s594_s28 = int_to_ptr.vmem [resolvable:$false] %s593_s28 }
  0x2e   : > { %s595_s4 = scalar_lea.vmem %s594_s28, 16384  ;;  %p596_p0 = scmp.lt.s32.totalorder %s778_s11, %s594_s28 }
  0x2f   : > { %p591_p5 = pnand %p589_p3, %p575_p4  ;;  %p597_p7 = scmp.lt.s32.totalorder %s595_s4, %s588_s25 }
  0x31   : > { %p592_p1 = pneg %p591_p5  ;;  %p598_p8 = por %p597_p7, %p596_p0 }
  0x33   : > { %p599_p10 = pnand %p598_p8, %p592_p1 }
  0x35   : > { %602 = shalt.err (!%p599_p10)
}
  0x36   : > { %s675_s5 = smov 1024   ;;  %s676_s6 = smov 64  }
  0x37   : > { %519 = dma.hbm_to_vmem [thread:$0]  (!%p774_p2), %s770_s9, 8192, %s778_s11, %s780_s13, %s675_s5, %s675_s5, %s676_s6  }
  0x38   : > { %p498_p12 = scmp.ge.s32.totalorder %s671_s22, 1  ;;  %p112_p4 = scmp.lt.s32.totalorder %s671_s22, 3 }
  0x3a   : > { %p113_p6 = pnand %p498_p12, %p112_p4 }
  0x3b   : > { %s811_s7 = sand.u32 (!%p113_p6), 1, %s663_s20  }
  0x3c   : > { %116 = sbr.rel (%p113_p6) target bundleno = 130 (0x82), region = 24  ;;  %s499_s8 = sshll.u32 (!%p113_p6), %s811_s7, 9 }
  0x3d   : > { %s119_s10 = scalar_lea.sflag (!%p113_p6), [#allocation5], %s811_s7  ;;  %s817_s14 = scalar_lea.vmem (!%p113_p6), [#allocation4], %s499_s8 }
  0x43   : > { %650 = dma.done.wait (%p750_p9), %s119_s10, 8192  }
  0x44   : > { %652 = vsyncadd (%p750_p9), %s119_s10, 4294959104  ;;  %s207_s9 = sld [smem:[#allocation3]]  ;;  %s501_s11 = sld [smem:[#allocation3 + $0x1]]  ;;  %v143_v0 = vld [vmem:[%s817_s14] sm:$0xff]  ;;  %v144_v3 = vld [vmem:[%s817_s14 + $0x8] sm:$0xff] }
  0x45   : > { %v145_v6 = vld [vmem:[%s817_s14 + $0x10] sm:$0xff]  ;;  %v146_v7 = vld [vmem:[%s817_s14 + $0x18] sm:$0xff]  ;;  %v147_v8 = vld [vmem:[%s817_s14 + $0x20] sm:$0xff]  ;;  %s856_s29 = scalar_lea.vmem [#allocation7], %s499_s8  ;;  %s511_s12 = sshll.u32 %s728_s0, 13 }
  0x46   : > { %v148_v12 = vld [vmem:[%s817_s14 + $0x28] sm:$0xff]  ;;  %v149_v13 = vld [vmem:[%s817_s14 + $0x30] sm:$0xff]  ;;  %v150_v14 = vld [vmem:[%s817_s14 + $0x38] sm:$0xff]  ;;  %s418_s13 = sshll.u32 %s856_s29, 4  ;;  %s1085_s16 = scalar_lea.hbm %s1140_s2, %s511_s12  ;;  %s1087_s13 = int_to_ptr.vmem [resolvable:$true] %s418_s13 }
  0x47   : > { %v151_v19 = vld [vmem:[%s817_s14 + $0x40] sm:$0xff]  ;;  %v152_v20 = vld [vmem:[%s817_s14 + $0x48] sm:$0xff]  ;;  %v153_v21 = vld [vmem:[%s817_s14 + $0x50] sm:$0xff]  ;;  %s404_s17 = scalar_lea.sflag [#allocation6], %s811_s7  ;;  %s603_s18 = scalar_lea.vmem %s1087_s13, 8192 }
  0x48   : > { %v154_v26 = vld [vmem:[%s817_s14 + $0x58] sm:$0xff]  ;;  %v155_v27 = vld [vmem:[%s817_s14 + $0x60] sm:$0xff]  ;;  %v156_v28 = vld [vmem:[%s817_s14 + $0x68] sm:$0xff]  ;;  %p604_p9 = scmp.ne.s32.totalorder %s1087_s13, %s603_s18  ;;  %p1147_p0 = scmp.ne.s32.totalorder %s1144_s30, 0 }
  0x49   : > { %v157_v33 = vld [vmem:[%s817_s14 + $0x70] sm:$0xff]  ;;  %v158_v34 = vld [vmem:[%s817_s14 + $0x78] sm:$0xff]  ;;  %v159_v39 = vld [vmem:[%s817_s14 + $0x80] sm:$0xff]  ;;  %s677_s23 = smov [#allocation7]  }
  0x4a   : > { %v824_v1 = vstv %s207_s9  ;;  %v826_v2 = vstv %s501_s11  ;;  %v160_v40 = vld [vmem:[%s817_s14 + $0x88] sm:$0xff]  ;;  %v161_v45 = vld [vmem:[%s817_s14 + $0x90] sm:$0xff]  ;;  %p605_p1 = pnand %p604_p9, %p1147_p0  ;;  %s607_s25 = sshll.u32 %s677_s23, 4  ;;  %s608_s25 = int_to_ptr.vmem [resolvable:$false] %s607_s25 }
  0x4b   : > { %v210_v4 = vmul.f32 %v824_v1, %v143_v0  ;;  %v211_v5 = vmul.f32 %v824_v1, %v144_v3  ;;  %v212_v9 = vmul.f32 %v824_v1, %v145_v6  ;;  %v213_v10 = vmul.f32 %v824_v1, %v146_v7  ;;  %v162_v46 = vld [vmem:[%s817_s14 + $0x98] sm:$0xff]  ;;  %v163_v47 = vld [vmem:[%s817_s14 + $0xa0] sm:$0xff]  ;;  %v164_v52 = vld [vmem:[%s817_s14 + $0xa8] sm:$0xff]  ;;  %s609_s26 = scalar_lea.vmem %s608_s25, 16384  ;;  %p610_p11 = scmp.lt.s32.totalorder %s1087_s13, %s608_s25 }
  0x4c   : > { %v214_v11 = vmul.f32 %v824_v1, %v147_v8  ;;  %v215_v17 = vmul.f32 %v824_v1, %v148_v12  ;;  %v216_v18 = vmul.f32 %v824_v1, %v149_v13  ;;  %v217_v25 = vmul.f32 %v824_v1, %v150_v14  ;;  %v165_v53 = vld [vmem:[%s817_s14 + $0xb0] sm:$0xff]  ;;  %v166_v58 = vld [vmem:[%s817_s14 + $0xb8] sm:$0xff]  ;;  %v167_v63 = vld [vmem:[%s817_s14 + $0xc0] sm:$0xff]  ;;  %p606_p2 = pneg %p605_p1  ;;  %p611_p13 = scmp.lt.s32.totalorder %s609_s26, %s603_s18 }
  0x4d   : > { %v275_v15 = vadd.f32 %v826_v2, %v210_v4  ;;  %v276_v16 = vadd.f32 %v826_v2, %v211_v5  ;;  %v277_v22 = vadd.f32 %v826_v2, %v212_v9  ;;  %v278_v23 = vadd.f32 %v826_v2, %v213_v10  ;;  %v168_v0 = vld [vmem:[%s817_s14 + $0xc8] sm:$0xff]  ;;  %v169_v7 = vld [vmem:[%s817_s14 + $0xd0] sm:$0xff]  ;;  %v170_v8 = vld [vmem:[%s817_s14 + $0xd8] sm:$0xff] }
  0x4e   : > { %v279_v24 = vadd.f32 %v826_v2, %v214_v11  ;;  %v280_v29 = vadd.f32 %v826_v2, %v215_v17  ;;  %v281_v30 = vadd.f32 %v826_v2, %v216_v18  ;;  %v218_v31 = vmul.f32 %v824_v1, %v151_v19  ;;  %v171_v9 = vld [vmem:[%s817_s14 + $0xe0] sm:$0xff]  ;;  %v172_v14 = vld [vmem:[%s817_s14 + $0xe8] sm:$0xff]  ;;  %p612_p3 = por %p611_p13, %p610_p11 }
  0x4f   : > { %339 = vst [vmem:[%s856_s29] sm:$0xff] %v275_v15  ;;  %340 = vst [vmem:[%s856_s29 + $0x8] sm:$0xff] %v276_v16  ;;  %v219_v32 = vmul.f32 %v824_v1, %v152_v20  ;;  %v282_v35 = vadd.f32 %v826_v2, %v217_v25  ;;  %v220_v36 = vmul.f32 %v824_v1, %v153_v21  ;;  %v173_v15 = vld [vmem:[%s817_s14 + $0xf0] sm:$0xff]  ;;  %v174_v20 = vld [vmem:[%s817_s14 + $0xf8] sm:$0xff] }
  0x50   : > { %341 = vst [vmem:[%s856_s29 + $0x10] sm:$0xff] %v277_v22  ;;  %342 = vst [vmem:[%s856_s29 + $0x18] sm:$0xff] %v278_v23  ;;  %v221_v37 = vmul.f32 %v824_v1, %v154_v26  ;;  %v222_v38 = vmul.f32 %v824_v1, %v155_v27  ;;  %v283_v41 = vadd.f32 %v826_v2, %v218_v31  ;;  %v175_v25 = vld [vmem:[%s817_s14 + $0x100] sm:$0xff]  ;;  %v176_v26 = vld [vmem:[%s817_s14 + $0x108] sm:$0xff]  ;;  %p613_p5 = pnand %p612_p3, %p606_p2 }
  0x51   : > { %343 = vst [vmem:[%s856_s29 + $0x20] sm:$0xff] %v279_v24  ;;  %344 = vst [vmem:[%s856_s29 + $0x28] sm:$0xff] %v280_v29  ;;  %v284_v42 = vadd.f32 %v826_v2, %v219_v32  ;;  %v223_v43 = vmul.f32 %v824_v1, %v156_v28  ;;  %v224_v44 = vmul.f32 %v824_v1, %v157_v33  ;;  %v177_v31 = vld [vmem:[%s817_s14 + $0x110] sm:$0xff]  ;;  %v178_v32 = vld [vmem:[%s817_s14 + $0x118] sm:$0xff] }
  0x52   : > { %345 = vst [vmem:[%s856_s29 + $0x30] sm:$0xff] %v281_v30  ;;  %346 = vst [vmem:[%s856_s29 + $0x38] sm:$0xff] %v282_v35  ;;  %v285_v48 = vadd.f32 %v826_v2, %v220_v36  ;;  %v286_v49 = vadd.f32 %v826_v2, %v221_v37  ;;  %v287_v50 = vadd.f32 %v826_v2, %v222_v38  ;;  %v179_v33 = vld [vmem:[%s817_s14 + $0x120] sm:$0xff]  ;;  %v180_v38 = vld [vmem:[%s817_s14 + $0x128] sm:$0xff] }
  0x53   : > { %v225_v51 = vmul.f32 %v824_v1, %v158_v34  ;;  %347 = vst [vmem:[%s856_s29 + $0x40] sm:$0xff] %v283_v41  ;;  %348 = vst [vmem:[%s856_s29 + $0x48] sm:$0xff] %v284_v42  ;;  %v288_v54 = vadd.f32 %v826_v2, %v223_v43  ;;  %v289_v55 = vadd.f32 %v826_v2, %v224_v44  ;;  %v182_v44 = vld [vmem:[%s817_s14 + $0x138] sm:$0xff] }
  0x54   : > { %v226_v56 = vmul.f32 %v824_v1, %v159_v39  ;;  %v227_v57 = vmul.f32 %v824_v1, %v160_v40  ;;  %349 = vst [vmem:[%s856_s29 + $0x50] sm:$0xff] %v285_v48  ;;  %350 = vst [vmem:[%s856_s29 + $0x58] sm:$0xff] %v286_v49  ;;  %v228_v60 = vmul.f32 %v824_v1, %v161_v45  ;;  %v181_v39 = vld [vmem:[%s817_s14 + $0x130] sm:$0xff]  ;;  %v183_v49 = vld [vmem:[%s817_s14 + $0x140] sm:$0xff] }
  0x55   : > { %351 = vst [vmem:[%s856_s29 + $0x60] sm:$0xff] %v287_v50  ;;  %v290_v59 = vadd.f32 %v826_v2, %v225_v51  ;;  %v229_v61 = vmul.f32 %v824_v1, %v162_v46  ;;  %v230_v62 = vmul.f32 %v824_v1, %v163_v47  ;;  %352 = vst [vmem:[%s856_s29 + $0x68] sm:$0xff] %v288_v54  ;;  %v184_v50 = vld [vmem:[%s817_s14 + $0x148] sm:$0xff] }
  0x56   : > { %353 = vst [vmem:[%s856_s29 + $0x70] sm:$0xff] %v289_v55  ;;  %v291_v3 = vadd.f32 %v826_v2, %v226_v56  ;;  %v292_v4 = vadd.f32 %v826_v2, %v227_v57  ;;  %v231_v5 = vmul.f32 %v824_v1, %v164_v52  ;;  %v232_v6 = vmul.f32 %v824_v1, %v165_v53  ;;  %v185_v55 = vld [vmem:[%s817_s14 + $0x150] sm:$0xff]  ;;  %v186_v56 = vld [vmem:[%s817_s14 + $0x158] sm:$0xff]  ;;  %v187_v57 = vld [vmem:[%s817_s14 + $0x160] sm:$0xff] }
  0x57   : > { %354 = vst [vmem:[%s856_s29 + $0x78] sm:$0xff] %v290_v59  ;;  %v293_v10 = vadd.f32 %v826_v2, %v228_v60  ;;  %v294_v11 = vadd.f32 %v826_v2, %v229_v61  ;;  %v295_v12 = vadd.f32 %v826_v2, %v230_v62  ;;  %v233_v13 = vmul.f32 %v824_v1, %v166_v58  ;;  %v188_v62 = vld [vmem:[%s817_s14 + $0x168] sm:$0xff] }
  0x58   : > { %355 = vst [vmem:[%s856_s29 + $0x80] sm:$0xff] %v291_v3  ;;  %356 = vst [vmem:[%s856_s29 + $0x88] sm:$0xff] %v292_v4  ;;  %v296_v16 = vadd.f32 %v826_v2, %v231_v5  ;;  %v297_v17 = vadd.f32 %v826_v2, %v232_v6  ;;  %v234_v18 = vmul.f32 %v824_v1, %v167_v63  ;;  %v189_v63 = vld [vmem:[%s817_s14 + $0x170] sm:$0xff]  ;;  %v190_v6 = vld [vmem:[%s817_s14 + $0x178] sm:$0xff] }
  0x59   : > { %v235_v19 = vmul.f32 %v824_v1, %v168_v0  ;;  %357 = vst [vmem:[%s856_s29 + $0x90] sm:$0xff] %v293_v10  ;;  %358 = vst [vmem:[%s856_s29 + $0x98] sm:$0xff] %v294_v11  ;;  %v298_v21 = vadd.f32 %v826_v2, %v233_v13  ;;  %v236_v22 = vmul.f32 %v824_v1, %v169_v7  ;;  %v191_v11 = vld [vmem:[%s817_s14 + $0x180] sm:$0xff] }
  0x5a   : > { %359 = vst [vmem:[%s856_s29 + $0xa0] sm:$0xff] %v295_v12  ;;  %v237_v23 = vmul.f32 %v824_v1, %v170_v8  ;;  %v238_v24 = vmul.f32 %v824_v1, %v171_v9  ;;  %360 = vst [vmem:[%s856_s29 + $0xa8] sm:$0xff] %v296_v16  ;;  %v299_v27 = vadd.f32 %v826_v2, %v234_v18  ;;  %v192_v12 = vld [vmem:[%s817_s14 + $0x188] sm:$0xff]  ;;  %v194_v18 = vld [vmem:[%s817_s14 + $0x198] sm:$0xff] }
  0x5b   : > { %361 = vst [vmem:[%s856_s29 + $0xb0] sm:$0xff] %v297_v17  ;;  %v300_v28 = vadd.f32 %v826_v2, %v235_v19  ;;  %v239_v29 = vmul.f32 %v824_v1, %v172_v14  ;;  %v240_v30 = vmul.f32 %v824_v1, %v173_v15  ;;  %362 = vst [vmem:[%s856_s29 + $0xb8] sm:$0xff] %v298_v21  ;;  %v193_v17 = vld [vmem:[%s817_s14 + $0x190] sm:$0xff]  ;;  %v195_v19 = vld [vmem:[%s817_s14 + $0x1a0] sm:$0xff] }
  0x5c   : > { %v301_v34 = vadd.f32 %v826_v2, %v236_v22  ;;  %v302_v35 = vadd.f32 %v826_v2, %v237_v23  ;;  %v303_v36 = vadd.f32 %v826_v2, %v238_v24  ;;  %v241_v37 = vmul.f32 %v824_v1, %v174_v20  ;;  %363 = vst [vmem:[%s856_s29 + $0xc0] sm:$0xff] %v299_v27  ;;  %v196_v24 = vld [vmem:[%s817_s14 + $0x1a8] sm:$0xff] }
  0x5d   : > { %364 = vst [vmem:[%s856_s29 + $0xc8] sm:$0xff] %v300_v28  ;;  %v304_v40 = vadd.f32 %v826_v2, %v239_v29  ;;  %v305_v41 = vadd.f32 %v826_v2, %v240_v30  ;;  %v242_v42 = vmul.f32 %v824_v1, %v175_v25  ;;  %v243_v43 = vmul.f32 %v824_v1, %v176_v26  ;;  %v197_v25 = vld [vmem:[%s817_s14 + $0x1b0] sm:$0xff]  ;;  %v198_v30 = vld [vmem:[%s817_s14 + $0x1b8] sm:$0xff] }
  0x5e   : > { %365 = vst [vmem:[%s856_s29 + $0xd0] sm:$0xff] %v301_v34  ;;  %366 = vst [vmem:[%s856_s29 + $0xd8] sm:$0xff] %v302_v35  ;;  %v306_v45 = vadd.f32 %v826_v2, %v241_v37  ;;  %v244_v46 = vmul.f32 %v824_v1, %v177_v31  ;;  %v245_v47 = vmul.f32 %v824_v1, %v178_v32  ;;  %v199_v35 = vld [vmem:[%s817_s14 + $0x1c0] sm:$0xff] }
  0x5f   : > { %367 = vst [vmem:[%s856_s29 + $0xe0] sm:$0xff] %v303_v36  ;;  %v246_v48 = vmul.f32 %v824_v1, %v179_v33  ;;  %368 = vst [vmem:[%s856_s29 + $0xe8] sm:$0xff] %v304_v40  ;;  %v307_v51 = vadd.f32 %v826_v2, %v242_v42  ;;  %v308_v52 = vadd.f32 %v826_v2, %v243_v43  ;;  %v200_v36 = vld [vmem:[%s817_s14 + $0x1c8] sm:$0xff]  ;;  %v202_v42 = vld [vmem:[%s817_s14 + $0x1d8] sm:$0xff] }
  0x60   : > { %369 = vst [vmem:[%s856_s29 + $0xf0] sm:$0xff] %v305_v41  ;;  %v247_v53 = vmul.f32 %v824_v1, %v180_v38  ;;  %v248_v54 = vmul.f32 %v824_v1, %v181_v39  ;;  %370 = vst [vmem:[%s856_s29 + $0xf8] sm:$0xff] %v306_v45  ;;  %v309_v58 = vadd.f32 %v826_v2, %v244_v46  ;;  %v201_v41 = vld [vmem:[%s817_s14 + $0x1d0] sm:$0xff]  ;;  %v203_v43 = vld [vmem:[%s817_s14 + $0x1e0] sm:$0xff] }
  0x61   : > { %v310_v59 = vadd.f32 %v826_v2, %v245_v47  ;;  %v311_v60 = vadd.f32 %v826_v2, %v246_v48  ;;  %v249_v61 = vmul.f32 %v824_v1, %v182_v44  ;;  %371 = vst [vmem:[%s856_s29 + $0x100] sm:$0xff] %v307_v51  ;;  %372 = vst [vmem:[%s856_s29 + $0x108] sm:$0xff] %v308_v52  ;;  %v204_v48 = vld [vmem:[%s817_s14 + $0x1e8] sm:$0xff] }
  0x62   : > { %v312_v0 = vadd.f32 %v826_v2, %v247_v53  ;;  %v313_v3 = vadd.f32 %v826_v2, %v248_v54  ;;  %v250_v4 = vmul.f32 %v824_v1, %v183_v49  ;;  %v251_v5 = vmul.f32 %v824_v1, %v184_v50  ;;  %373 = vst [vmem:[%s856_s29 + $0x110] sm:$0xff] %v309_v58  ;;  %v205_v49 = vld [vmem:[%s817_s14 + $0x1f0] sm:$0xff]  ;;  %v206_v54 = vld [vmem:[%s817_s14 + $0x1f8] sm:$0xff] }
  0x63   : > { %374 = vst [vmem:[%s856_s29 + $0x118] sm:$0xff] %v310_v59  ;;  %375 = vst [vmem:[%s856_s29 + $0x120] sm:$0xff] %v311_v60  ;;  %v314_v7 = vadd.f32 %v826_v2, %v249_v61  ;;  %v252_v8 = vmul.f32 %v824_v1, %v185_v55  ;;  %v253_v9 = vmul.f32 %v824_v1, %v186_v56 }
  0x64   : > { %v254_v10 = vmul.f32 %v824_v1, %v187_v57  ;;  %376 = vst [vmem:[%s856_s29 + $0x128] sm:$0xff] %v312_v0  ;;  %377 = vst [vmem:[%s856_s29 + $0x130] sm:$0xff] %v313_v3  ;;  %v315_v13 = vadd.f32 %v826_v2, %v250_v4  ;;  %v316_v14 = vadd.f32 %v826_v2, %v251_v5 }
  0x65   : > { %v255_v15 = vmul.f32 %v824_v1, %v188_v62  ;;  %v256_v16 = vmul.f32 %v824_v1, %v189_v63  ;;  %378 = vst [vmem:[%s856_s29 + $0x138] sm:$0xff] %v314_v7  ;;  %v317_v20 = vadd.f32 %v826_v2, %v252_v8  ;;  %v318_v21 = vadd.f32 %v826_v2, %v253_v9 }
  0x66   : > { %v319_v22 = vadd.f32 %v826_v2, %v254_v10  ;;  %v257_v23 = vmul.f32 %v824_v1, %v190_v6  ;;  %379 = vst [vmem:[%s856_s29 + $0x140] sm:$0xff] %v315_v13  ;;  %380 = vst [vmem:[%s856_s29 + $0x148] sm:$0xff] %v316_v14  ;;  %v258_v28 = vmul.f32 %v824_v1, %v191_v11 }
  0x67   : > { %v320_v26 = vadd.f32 %v826_v2, %v255_v15  ;;  %v321_v27 = vadd.f32 %v826_v2, %v256_v16  ;;  %v259_v29 = vmul.f32 %v824_v1, %v192_v12  ;;  %381 = vst [vmem:[%s856_s29 + $0x150] sm:$0xff] %v317_v20  ;;  %382 = vst [vmem:[%s856_s29 + $0x158] sm:$0xff] %v318_v21 }
  0x68   : > { %383 = vst [vmem:[%s856_s29 + $0x160] sm:$0xff] %v319_v22  ;;  %v322_v31 = vadd.f32 %v826_v2, %v257_v23  ;;  %v260_v32 = vmul.f32 %v824_v1, %v193_v17  ;;  %v261_v33 = vmul.f32 %v824_v1, %v194_v18  ;;  %v262_v34 = vmul.f32 %v824_v1, %v195_v19 }
  0x69   : > { %384 = vst [vmem:[%s856_s29 + $0x168] sm:$0xff] %v320_v26  ;;  %385 = vst [vmem:[%s856_s29 + $0x170] sm:$0xff] %v321_v27  ;;  %v323_v37 = vadd.f32 %v826_v2, %v258_v28  ;;  %v324_v38 = vadd.f32 %v826_v2, %v259_v29  ;;  %v263_v39 = vmul.f32 %v824_v1, %v196_v24 }
  0x6a   : > { %v264_v40 = vmul.f32 %v824_v1, %v197_v25  ;;  %386 = vst [vmem:[%s856_s29 + $0x178] sm:$0xff] %v322_v31  ;;  %v325_v44 = vadd.f32 %v826_v2, %v260_v32  ;;  %v326_v45 = vadd.f32 %v826_v2, %v261_v33  ;;  %v327_v46 = vadd.f32 %v826_v2, %v262_v34 }
  0x6b   : > { %v265_v47 = vmul.f32 %v824_v1, %v198_v30  ;;  %387 = vst [vmem:[%s856_s29 + $0x180] sm:$0xff] %v323_v37  ;;  %388 = vst [vmem:[%s856_s29 + $0x188] sm:$0xff] %v324_v38  ;;  %v328_v50 = vadd.f32 %v826_v2, %v263_v39  ;;  %v266_v52 = vmul.f32 %v824_v1, %v199_v35 }
  0x6c   : > { %v329_v51 = vadd.f32 %v826_v2, %v264_v40  ;;  %v267_v53 = vmul.f32 %v824_v1, %v200_v36  ;;  %389 = vst [vmem:[%s856_s29 + $0x190] sm:$0xff] %v325_v44  ;;  %390 = vst [vmem:[%s856_s29 + $0x198] sm:$0xff] %v326_v45  ;;  %v268_v56 = vmul.f32 %v824_v1, %v201_v41 }
  0x6d   : > { %391 = vst [vmem:[%s856_s29 + $0x1a0] sm:$0xff] %v327_v46  ;;  %v330_v55 = vadd.f32 %v826_v2, %v265_v47  ;;  %v269_v57 = vmul.f32 %v824_v1, %v202_v42  ;;  %v270_v58 = vmul.f32 %v824_v1, %v203_v43  ;;  %392 = vst [vmem:[%s856_s29 + $0x1a8] sm:$0xff] %v328_v50 }
  0x6e   : > { %393 = vst [vmem:[%s856_s29 + $0x1b0] sm:$0xff] %v329_v51  ;;  %v331_v59 = vadd.f32 %v826_v2, %v266_v52  ;;  %v332_v60 = vadd.f32 %v826_v2, %v267_v53  ;;  %v271_v61 = vmul.f32 %v824_v1, %v204_v48  ;;  %v272_v62 = vmul.f32 %v824_v1, %v205_v49 }
  0x6f   : > { %394 = vst [vmem:[%s856_s29 + $0x1b8] sm:$0xff] %v330_v55  ;;  %v333_v63 = vadd.f32 %v826_v2, %v268_v56  ;;  %v334_v0 = vadd.f32 %v826_v2, %v269_v57  ;;  %v335_v3 = vadd.f32 %v826_v2, %v270_v58  ;;  %v273_v4 = vmul.f32 %v824_v1, %v206_v54 }
  0x70   : > { %395 = vst [vmem:[%s856_s29 + $0x1c0] sm:$0xff] %v331_v59  ;;  %396 = vst [vmem:[%s856_s29 + $0x1c8] sm:$0xff] %v332_v60  ;;  %v336_v5 = vadd.f32 %v826_v2, %v271_v61  ;;  %v337_v6 = vadd.f32 %v826_v2, %v272_v62 }
  0x71   : > { %397 = vst [vmem:[%s856_s29 + $0x1d0] sm:$0xff] %v333_v63  ;;  %398 = vst [vmem:[%s856_s29 + $0x1d8] sm:$0xff] %v334_v0  ;;  %v338_v1 = vadd.f32 %v826_v2, %v273_v4 }
  0x72   : > { %399 = vst [vmem:[%s856_s29 + $0x1e0] sm:$0xff] %v335_v3  ;;  %400 = vst [vmem:[%s856_s29 + $0x1e8] sm:$0xff] %v336_v5 }
  0x73   : > { %401 = vst [vmem:[%s856_s29 + $0x1f0] sm:$0xff] %v337_v6  ;;  %402 = vst [vmem:[%s856_s29 + $0x1f8] sm:$0xff] %v338_v1 }
  0x74   : > { %616 = shalt.err (!%p613_p5)
}
  0x75   : > { %s617_s28 = scalar_lea.hbm %s1085_s16, 8192  ;;  %s621_s6 = scalar_lea.hbm %s1140_s2, 16384 }
  0x76   : > { %p618_p7 = scmp.ne.s32.totalorder %s1085_s16, %s617_s28  ;;  %p622_p12 = scmp.lt.u32.totalorder %s1085_s16, %s1140_s2 }
  0x77   : > { %p623_p4 = scmp.lt.u32.totalorder %s621_s6, %s617_s28  ;;  %p625_p9 = scmp.lt.u32.totalorder %s617_s28, %s1085_s16 }
  0x78   : > { %p619_p8 = pnand %p618_p7, %p1147_p0 }
  0x79   : > { %p624_p6 = por %p623_p4, %p622_p12 }
  0x7a   : > { %p620_p10 = pneg %p619_p8 }
  0x7b   : > { %p626_p1 = por %p625_p9, %p624_p6 }
  0x7d   : > { %p627_p2 = pnand %p626_p1, %p620_p10 }
  0x7f   : > { %630 = shalt.err (!%p627_p2)
}
  0x80   : > { %s678_s14 = smov 1024   ;;  %s679_s9 = smov 64  }
  0x81   : > { %514 = dma.vmem_to_hbm [thread:$0]  (%p1147_p0), %s1087_s13, 8192, %s1085_s16, %s404_s17, %s678_s14, %s678_s14, %s679_s9  }
  0x82 PF: > { %s433_s11 = sand.u32 1, %s659_s19   ;;  %p1148_p11 = scmp.ne.s32.totalorder %s1145_s3, 0 }
  0x83   : > { %p1149_p13 = scmp.ge.s32.totalorder %s671_s22, 2  ;;  %s434_s29 = scalar_lea.sflag [#allocation6], %s433_s11 }
  0x85   : > { %p521_p3 = pnand %p1149_p13, %p1148_p11 }
  0x87   : > { %654 = dma.done.wait (!%p521_p3), %s434_s29, 8192  }
  0x88   : > { %656 = vsyncadd (!%p521_p3), %s434_s29, 4294959104  ;;  %p19_p5 = scmp.ge.s32.totalorder %s732_s24, 4   ;;  %s1150_s19 = smov %s663_s20 }
  0x89   : > { %s1151_s20 = smov %s667_s21  ;;  %s1152_s21 = smov %s744_s27 }
  0x8a   : > { %s1153_s22 = smov %s732_s24  ;;  %21 = sbr.rel (!%p19_p5) target bundleno = 17 (0x11), region = 69 }
  0x91   :  { %439 = vsyncpa [#allocation5], 1 }
  0x92   :  { %441 = vsyncpa [#allocation5 + $0x1], 1 }
  0x93   :  { %442 = vsyncpa [#allocation6], 1 }
  0x94   :  { %444 = vsyncpa [#allocation6 + $0x1], 1 }

</bundles_post_ra>
